<compile_context>
chip_gen: v6e
topology: v6e:2x2x1
jax: 0.10.0
libtpu: 0.0.40
codegen_flags: <defaults>
</compile_context>

<pallas_src>
import functools

import jax
import jax.numpy as jnp
from jax import lax
from jax.experimental import pallas as pl
from jax.experimental.pallas import tpu as pltpu


# ---------------------------------------------------------------------------
# Fused kernel: reduce 1x1 (+proj) + 3x3 (im2col) + CReLU/BN + expand + residual.
# ---------------------------------------------------------------------------
def _fused_mcrelu_kernel(*refs, W, off, KS, Cred, C3, Cout, vec_off,
                         pre_act, last_act, proj, stack_proj):
    if proj and not stack_proj:
        (x_ref, wr_ref, w3_ref, we_ref, vec_ref, m_ref, wp_ref,
         o_ref, hp_scr, col_scr) = refs
    else:
        (x_ref, wr_ref, w3_ref, we_ref, vec_ref, m_ref,
         o_ref, hp_scr, col_scr) = refs
        wp_ref = None

    x = x_ref[0].astype(jnp.float32)                    # (Cin, HW), pixels on lanes
    HW = x.shape[1]
    half = KS // 2
    mm_dt = wr_ref.dtype                                # MXU operand dtype (f32/bf16)

    v = vec_ref[...]                                    # (Vtot, 1) packed bias slab
    br = v[vec_off["br"]:vec_off["br"] + Cred]
    sp = v[vec_off["sp"]:vec_off["sp"] + C3]
    tp = v[vec_off["tp"]:vec_off["tp"] + C3]
    sn = v[vec_off["sn"]:vec_off["sn"] + C3]
    tn = v[vec_off["tn"]:vec_off["tn"] + C3]
    be = v[vec_off["be"]:vec_off["be"] + Cout]
    bp = v[vec_off["bp"]:vec_off["bp"] + Cout] if proj else None

    # ---- reduce 1x1 (+ optional preAct ReLU) [+ stacked projection 1x1] -----
    x_in = jnp.maximum(x, 0.0) if pre_act else x
    r = jnp.dot(wr_ref[...], x_in.astype(mm_dt),
                preferred_element_type=jnp.float32)
    if stack_proj:
        h_pre = r[:Cred]                                 # reduce rows
        sc = r[Cred:Cred + Cout] + bp                    # projection rows (raw x)
    else:
        h_pre = r
        if proj:                                         # preAct=True: proj on raw x
            sc = jnp.dot(wp_ref[...], x.astype(mm_dt),
                         preferred_element_type=jnp.float32) + bp
        else:
            sc = x                                       # identity (Cout == Cin)
    h = jnp.maximum(h_pre + br, 0.0)                     # (Cred, HW)

    # ---- 3x3 conv as ONE K = KS*KS*Cred im2col matmul ------------------------
    # hp_scr: zero-padded flattened copy of h so every shifted tap window is a
    # plain lane-offset read (pads handle the top/bottom image border).  Only
    # the two pad slivers are zeroed; the middle is fully overwritten.
    hp_scr[:, :off] = jnp.zeros((Cred, off), jnp.float32)
    hp_scr[:, off + HW:] = jnp.zeros((Cred, off), jnp.float32)
    hp_scr[:, off:off + HW] = h                          # aligned (off % 128 == 0)

    m_all = m_ref[...]                                   # (KS, HW) row-wrap masks
    for kx in range(KS):
        rx = kx - half
        if rx != 0:                                      # hoist broadcast out of ky loop
            mk = jnp.broadcast_to(m_all[kx:kx + 1, :], (Cred, HW))
        for ky in range(KS):
            j = ky * KS + kx
            d = (ky - half) * W + rx                     # flat pixel displacement
            win = hp_scr[:, off + d:off + d + HW]        # shifted h, zero-filled ends
            col_scr[j * Cred:(j + 1) * Cred, :] = win if rx == 0 else win * mk

    c = jnp.dot(w3_ref[...], col_scr[...].astype(mm_dt),
                preferred_element_type=jnp.float32)      # (C3, HW)

    # ---- CReLU concat(c, -c) -> folded BN (b3 pre-folded) -> ReLU ------------
    z = jnp.concatenate([jnp.maximum(c * sp + tp, 0.0),
                         jnp.maximum(-c * sn + tn, 0.0)], axis=0)   # (2*C3, HW)

    # ---- expand 1x1: single merged matmul + bias (+ last ReLU) ---------------
    y = jnp.dot(we_ref[...], z.astype(mm_dt),
                preferred_element_type=jnp.float32) + be
    if last_act:
        y = jnp.maximum(y, 0.0)

    # ---- residual add ---------------------------------------------------------
    o_ref[0] = (y + sc).astype(o_ref.dtype)


# ---------------------------------------------------------------------------
# Public forward (NCHW in / NCHW out, like the PyTorch module).
# ---------------------------------------------------------------------------
def mcrelu_residual_forward(x_nchw, params, *, in_stride=1, proj=False,
                            pre_act=False, last_act=True, eps=1e-5,
                            use_bf16_matmul=False):
    if in_stride > 1:
        assert proj, "in_stride > 1 requires a projection shortcut"
        xs = x_nchw[:, :, ::in_stride, ::in_stride]      # stride-s 1x1 conv == subsample
    else:
        xs = x_nchw
    N, Cin, H, W = xs.shape
    HW = H * W

    Cred = params["w_reduce"].shape[1]
    KS = params["w3"].shape[0]
    C3 = params["w3"].shape[-1]
    Cout = params["w_expand"].shape[1]
    if not proj:
        assert Cout == Cin, (
            "identity shortcut requires n_out == n_in (got %d vs %d); use proj=True"
            % (Cout, Cin))

    f32 = jnp.float32
    mm_dt = jnp.bfloat16 if use_bf16_matmul else f32
    half = KS // 2

    # --- weights in C-major (out_ch, in_ch) layout -----------------------------
    wr = params["w_reduce"].T.astype(f32)                              # (Cred, Cin)
    w3m = jnp.transpose(params["w3"], (3, 0, 1, 2)).reshape(
        C3, KS * KS * Cred).astype(f32)                                # (C3, 9*Cred)
    we = jnp.concatenate([params["w_expand"][:C3, :].T,
                          params["w_expand"][C3:, :].T], axis=1).astype(f32)  # (Cout, 2*C3)

    # --- fold BN (inference) and b3 into per-half scale/shift ------------------
    scale = (params["bn_gamma"] / jnp.sqrt(params["bn_var"] + eps)).astype(f32)
    shift = (params["bn_beta"] - params["bn_mean"] * scale).astype(f32)
    b3 = params["b3"].astype(f32)
    sp, sn = scale[:C3], scale[C3:]
    tp = shift[:C3] + b3 * sp
    tn = shift[C3:] - b3 * sn

    stack_proj = bool(proj) and not pre_act
    if proj:
        wp = params["w_proj"].T.astype(f32)                            # (Cout, Cin)
        bp = params["b_proj"].astype(f32)
    wrp = jnp.concatenate([wr, wp], axis=0) if stack_proj else wr      # (Cred[+Cout], Cin)

    # --- pack all per-channel vectors into one slab (one DMA) ------------------
    segs = [("br", params["b_reduce"].astype(f32)),
            ("sp", sp), ("tp", tp), ("sn", sn), ("tn", tn),
            ("be", params["b_expand"].astype(f32))]
    if proj:
        segs.append(("bp", bp))
    vec_off, parts, cur = {}, [], 0
    for name, seg in segs:
        vec_off[name] = cur
        n = seg.shape[0]
        pn = -(-n // 8) * 8                               # 8-row (sublane) aligned segments
        parts.append(jnp.pad(seg, (0, pn - n)))
        cur += pn
    vec = jnp.concatenate(parts).reshape(cur, 1)

    # --- per-tap left/right border masks (zero destinations whose SOURCE column
    #     would wrap into a neighbouring image row) ------------------------------
    col_x = jnp.arange(HW, dtype=jnp.int32) % W
    rows = []
    for kx in range(KS):
        rx = kx - half
        if rx > 0:                                        # source col = c + rx > W-1
            ok = (col_x <= (W - 1 - rx))
        elif rx < 0:                                      # source col = c + rx < 0
            ok = (col_x >= -rx)
        else:
            ok = jnp.ones((HW,), jnp.bool_)
        rows.append(ok.astype(f32))
    m = jnp.stack(rows, axis=0)                           # (KS, HW)

    # Zero-pad offset for flattened h: lane-aligned, >= max |flat shift|.
    off = ((half * (W + 1) + 127) // 128) * 128

    x_flat = xs.reshape(N, Cin, HW)                       # free reshape (NCHW -> C-major)

    inputs = [x_flat, wrp.astype(mm_dt), w3m.astype(mm_dt), we.astype(mm_dt), vec, m]
    in_specs = [pl.BlockSpec((1, Cin, HW), lambda n: (n, 0, 0))]
    for a in inputs[1:]:
        in_specs.append(pl.BlockSpec(a.shape, lambda n, _nd=a.ndim: (0,) * _nd))
    if proj and not stack_proj:
        inputs.append(wp.astype(mm_dt))
        in_specs.append(pl.BlockSpec(wp.shape, lambda n: (0, 0)))

    kernel = functools.partial(
        _fused_mcrelu_kernel, W=W, off=off, KS=KS, Cred=Cred, C3=C3, Cout=Cout,
        vec_off=vec_off, pre_act=pre_act, last_act=last_act, proj=proj,
        stack_proj=stack_proj)

    out = pl.pallas_call(
        kernel,
        out_shape=jax.ShapeDtypeStruct((N, Cout, HW), x_nchw.dtype),
        grid=(N,),
        in_specs=in_specs,
        out_specs=pl.BlockSpec((1, Cout, HW), lambda n: (n, 0, 0)),
        scratch_shapes=[
            pltpu.VMEM((Cred, HW + 2 * off), jnp.float32),   # zero-padded h
            pltpu.VMEM((KS * KS * Cred, HW), jnp.float32),   # im2col matrix
        ],
        compiler_params=pltpu.CompilerParams(
            dimension_semantics=("parallel",)),              # 1 image per TC on v7x
    )(*inputs)

    return out.reshape(N, Cout, H, W)                        # NCHW out


# ---------------------------------------------------------------------------
# Pure-JAX reference (same semantics as the PyTorch module) for correctness.
# ---------------------------------------------------------------------------
def _reference_forward(x_nchw, params, *, in_stride=1, proj=False,
                       pre_act=False, last_act=True, eps=1e-5):
    dn = ("NHWC", "HWIO", "NHWC")
    KS = params["w3"].shape[0]
    half = KS // 2
    x = jnp.transpose(x_nchw, (0, 2, 3, 1)).astype(jnp.float32)
    x_sc = x
    h = jnp.maximum(x, 0.0) if pre_act else x
    n_in, n_red = params["w_reduce"].shape
    h = lax.conv_general_dilated(h, params["w_reduce"].reshape(1, 1, n_in, n_red),
                                 (in_stride, in_stride), "VALID", dimension_numbers=dn)
    h = jnp.maximum(h + params["b_reduce"], 0.0)
    h = lax.conv_general_dilated(h, params["w3"], (1, 1),
                                 ((half, half), (half, half)),
                                 dimension_numbers=dn) + params["b3"]
    h = jnp.concatenate([h, -h], axis=-1)
    h = ((h - params["bn_mean"]) / jnp.sqrt(params["bn_var"] + eps)
         * params["bn_gamma"] + params["bn_beta"])
    h = jnp.maximum(h, 0.0)
    c2, n_out = params["w_expand"].shape
    h = lax.conv_general_dilated(h, params["w_expand"].reshape(1, 1, c2, n_out),
                                 (1, 1), "VALID", dimension_numbers=dn)
    h = h + params["b_expand"]
    if last_act:
        h = jnp.maximum(h, 0.0)
    if proj:
        x_sc = lax.conv_general_dilated(x_sc, params["w_proj"].reshape(1, 1, n_in, n_out),
                                        (in_stride, in_stride), "VALID",
                                        dimension_numbers=dn) + params["b_proj"]
    h = h + x_sc
    return jnp.transpose(h, (0, 3, 1, 2))


if __name__ == "__main__":
    # mCReLU_residual(n_in=16, n_red=8, n_3x3=8, n_out=16) -- default flags.
    N, n_in, H, W = 2, 16, 16, 16
    n_red, n_3x3, n_out = 8, 8, 16

    key = jax.random.PRNGKey(0)
    ks = jax.random.split(key, 16)
    x_nchw = jax.random.normal(ks[0], (N, n_in, H, W), jnp.float32)

    params = dict(
        w_reduce=0.1 * jax.random.normal(ks[1], (n_in, n_red), jnp.float32),
        b_reduce=0.1 * jax.random.normal(ks[2], (n_red,), jnp.float32),
        w3=0.1 * jax.random.normal(ks[3], (3, 3, n_red, n_3x3), jnp.float32),
        b3=0.1 * jax.random.normal(ks[4], (n_3x3,), jnp.float32),
        bn_gamma=1.0 + 0.1 * jax.random.normal(ks[5], (2 * n_3x3,), jnp.float32),
        bn_beta=0.1 * jax.random.normal(ks[6], (2 * n_3x3,), jnp.float32),
        bn_mean=0.1 * jax.random.normal(ks[7], (2 * n_3x3,), jnp.float32),
        bn_var=jax.random.uniform(ks[8], (2 * n_3x3,), jnp.float32, 0.5, 1.5),
        w_expand=0.1 * jax.random.normal(ks[9], (2 * n_3x3, n_out), jnp.float32),
        b_expand=0.1 * jax.random.normal(ks[10], (n_out,), jnp.float32),
    )

    # 1) default config (identity shortcut), f32 matmuls: tight tolerance.
    out = jax.block_until_ready(
        jax.jit(lambda x, p: mcrelu_residual_forward(x, p))(x_nchw, params))
    ref = _reference_forward(x_nchw, params)
    assert out.shape == (N, n_out, H, W), out.shape
    err = float(jnp.max(jnp.abs(out - ref)))
    assert jnp.allclose(out, ref, atol=1e-4, rtol=1e-4), err

    # 2) projection shortcut (stacked reduce+proj matmul), n_out != n_in.
    n_out_p = 32
    params_p = dict(params)
    params_p["w_expand"] = 0.1 * jax.random.normal(ks[11], (2 * n_3x3, n_out_p), jnp.float32)
    params_p["b_expand"] = 0.1 * jax.random.normal(ks[12], (n_out_p,), jnp.float32)
    params_p["w_proj"] = 0.1 * jax.random.normal(ks[13], (n_in, n_out_p), jnp.float32)
    params_p["b_proj"] = 0.1 * jax.random.normal(ks[14], (n_out_p,), jnp.float32)
    out_p = jax.block_until_ready(
        jax.jit(lambda x, p: mcrelu_residual_forward(x, p, proj=True))(x_nchw, params_p))
    ref_p = _reference_forward(x_nchw, params_p, proj=True)
    err_p = float(jnp.max(jnp.abs(out_p - ref_p)))
    assert jnp.allclose(out_p, ref_p, atol=1e-4, rtol=1e-4), err_p

    # 3) bf16 MXU operands (f32 accumulate): looser tolerance by design.
    out_bf = jax.block_until_ready(
        jax.jit(lambda x, p: mcrelu_residual_forward(x, p, use_bf16_matmul=True))(
            x_nchw, params))
    err_bf = float(jnp.max(jnp.abs(out_bf - ref)))
    assert jnp.allclose(out_bf, ref, atol=5e-2, rtol=5e-2), err_bf

    print("KERNEL_OK")
</pallas_src>

<mosaic_0001>
module attributes {stable_mosaic.version = 11 : i64} {
  func.func @_fused_mcrelu_kernel(%arg0: i32, %arg1: memref<1x16x256xf32, #tpu.memory_space<vmem>>, %arg2: memref<8x16xf32, #tpu.memory_space<vmem>>, %arg3: memref<8x72xf32, #tpu.memory_space<vmem>>, %arg4: memref<16x16xf32, #tpu.memory_space<vmem>>, %arg5: memref<56x1xf32, #tpu.memory_space<vmem>>, %arg6: memref<3x256xf32, #tpu.memory_space<vmem>>, %arg7: memref<1x16x256xf32, #tpu.memory_space<vmem>>, %arg8: memref<8x512xf32, #tpu.memory_space<vmem>>, %arg9: memref<72x256xf32, #tpu.memory_space<vmem>>) attributes {dimension_semantics = [#tpu.dimension_semantics<parallel>], iteration_bounds = array<i64: 2>, scalar_prefetch = 0 : i64, scratch_operands = 2 : i64, tpu.core_type = #tpu.core_type<tc>, window_params = [{transform_indices = @transform_0, window_bounds = array<i64: 1, 16, 256>}, {pipeline_mode = #tpu.pipeline_mode<synchronous>, transform_indices = @transform_1, window_bounds = array<i64: 8, 16>}, {pipeline_mode = #tpu.pipeline_mode<synchronous>, transform_indices = @transform_2, window_bounds = array<i64: 8, 72>}, {pipeline_mode = #tpu.pipeline_mode<synchronous>, transform_indices = @transform_3, window_bounds = array<i64: 16, 16>}, {pipeline_mode = #tpu.pipeline_mode<synchronous>, transform_indices = @transform_4, window_bounds = array<i64: 56, 1>}, {pipeline_mode = #tpu.pipeline_mode<synchronous>, transform_indices = @transform_5, window_bounds = array<i64: 3, 256>}, {transform_indices = @transform_6, window_bounds = array<i64: 1, 16, 256>}]} {
    %c0 = arith.constant 0 : index
    %c0_0 = arith.constant 0 : index
    %c0_1 = arith.constant 0 : index
    %0 = vector.load %arg1[%c0, %c0_0, %c0_1] : memref<1x16x256xf32, #tpu.memory_space<vmem>>, vector<1x16x256xf32>
    %1 = vector.shape_cast %0 : vector<1x16x256xf32> to vector<16x256xf32>
    %c0_2 = arith.constant 0 : index
    %c0_3 = arith.constant 0 : index
    %2 = vector.load %arg5[%c0_2, %c0_3] : memref<56x1xf32, #tpu.memory_space<vmem>>, vector<56x1xf32>
    %3 = vector.extract_strided_slice %2 {offsets = [0, 0], sizes = [8, 1], strides = [1, 1]} : vector<56x1xf32> to vector<8x1xf32>
    %4 = vector.extract_strided_slice %2 {offsets = [8, 0], sizes = [8, 1], strides = [1, 1]} : vector<56x1xf32> to vector<8x1xf32>
    %5 = vector.extract_strided_slice %2 {offsets = [16, 0], sizes = [8, 1], strides = [1, 1]} : vector<56x1xf32> to vector<8x1xf32>
    %6 = vector.extract_strided_slice %2 {offsets = [24, 0], sizes = [8, 1], strides = [1, 1]} : vector<56x1xf32> to vector<8x1xf32>
    %7 = vector.extract_strided_slice %2 {offsets = [32, 0], sizes = [8, 1], strides = [1, 1]} : vector<56x1xf32> to vector<8x1xf32>
    %8 = vector.extract_strided_slice %2 {offsets = [40, 0], sizes = [16, 1], strides = [1, 1]} : vector<56x1xf32> to vector<16x1xf32>
    %c0_4 = arith.constant 0 : index
    %c0_5 = arith.constant 0 : index
    %9 = vector.load %arg2[%c0_4, %c0_5] : memref<8x16xf32, #tpu.memory_space<vmem>>, vector<8x16xf32>
    %cst = arith.constant dense<0.000000e+00> : vector<8x256xf32>
    %10 = tpu.matmul %9, %1, %cst {dimension_numbers = #tpu.dot_dimension_numbers<[1], [0], [0], [1], [0, 0, 1, 1], [], []>} : vector<8x16xf32>, vector<16x256xf32>, vector<8x256xf32> -> vector<8x256xf32>
    %11 = vector.broadcast %3 : vector<8x1xf32> to vector<8x256xf32>
    %12 = arith.addf %10, %11 : vector<8x256xf32>
    %cst_6 = arith.constant 0.000000e+00 : f32
    %13 = vector.broadcast %cst_6 : f32 to vector<8x256xf32>
    %14 = arith.maximumf %12, %13 : vector<8x256xf32>
    %cst_7 = arith.constant 0.000000e+00 : f32
    %15 = vector.broadcast %cst_7 : f32 to vector<8x128xf32>
    %c0_8 = arith.constant 0 : index
    %c0_9 = arith.constant 0 : index
    %16 = vector.load %arg8[%c0_8, %c0_9] : memref<8x512xf32, #tpu.memory_space<vmem>>, vector<8x128xf32>
    tpu.vector_store %arg8[%c0_8, %c0_9], %15 {strides = array<i32>} : memref<8x512xf32, #tpu.memory_space<vmem>>, vector<8x128xf32>,
    %cst_10 = arith.constant 0.000000e+00 : f32
    %17 = vector.broadcast %cst_10 : f32 to vector<8x128xf32>
    %c0_11 = arith.constant 0 : index
    %c384 = arith.constant 384 : index
    %18 = vector.load %arg8[%c0_11, %c384] : memref<8x512xf32, #tpu.memory_space<vmem>>, vector<8x128xf32>
    tpu.vector_store %arg8[%c0_11, %c384], %17 {strides = array<i32>} : memref<8x512xf32, #tpu.memory_space<vmem>>, vector<8x128xf32>,
    %c0_12 = arith.constant 0 : index
    %c128 = arith.constant 128 : index
    %19 = vector.load %arg8[%c0_12, %c128] : memref<8x512xf32, #tpu.memory_space<vmem>>, vector<8x256xf32>
    tpu.vector_store %arg8[%c0_12, %c128], %14 {strides = array<i32>} : memref<8x512xf32, #tpu.memory_space<vmem>>, vector<8x256xf32>,
    %c0_13 = arith.constant 0 : index
    %c0_14 = arith.constant 0 : index
    %20 = vector.load %arg6[%c0_13, %c0_14] : memref<3x256xf32, #tpu.memory_space<vmem>>, vector<3x256xf32>
    %21 = vector.extract_strided_slice %20 {offsets = [0, 0], sizes = [1, 256], strides = [1, 1]} : vector<3x256xf32> to vector<1x256xf32>
    %22 = vector.shape_cast %21 : vector<1x256xf32> to vector<1x256xf32>
    %23 = vector.broadcast %22 : vector<1x256xf32> to vector<8x256xf32>
    %c0_15 = arith.constant 0 : index
    %c111 = arith.constant 111 : index
    %24 = vector.load %arg8[%c0_15, %c111] : memref<8x512xf32, #tpu.memory_space<vmem>>, vector<8x256xf32>
    %25 = arith.mulf %24, %23 : vector<8x256xf32>
    %c0_16 = arith.constant 0 : index
    %c0_17 = arith.constant 0 : index
    %26 = vector.load %arg9[%c0_16, %c0_17] : memref<72x256xf32, #tpu.memory_space<vmem>>, vector<8x256xf32>
    tpu.vector_store %arg9[%c0_16, %c0_17], %25 {strides = array<i32>} : memref<72x256xf32, #tpu.memory_space<vmem>>, vector<8x256xf32>,
    %c0_18 = arith.constant 0 : index
    %c127 = arith.constant 127 : index
    %27 = vector.load %arg8[%c0_18, %c127] : memref<8x512xf32, #tpu.memory_space<vmem>>, vector<8x256xf32>
    %28 = arith.mulf %27, %23 : vector<8x256xf32>
    %c24 = arith.constant 24 : index
    %c0_19 = arith.constant 0 : index
    %29 = vector.load %arg9[%c24, %c0_19] : memref<72x256xf32, #tpu.memory_space<vmem>>, vector<8x256xf32>
    tpu.vector_store %arg9[%c24, %c0_19], %28 {strides = array<i32>} : memref<72x256xf32, #tpu.memory_space<vmem>>, vector<8x256xf32>,
    %c0_20 = arith.constant 0 : index
    %c143 = arith.constant 143 : index
    %30 = vector.load %arg8[%c0_20, %c143] : memref<8x512xf32, #tpu.memory_space<vmem>>, vector<8x256xf32>
    %31 = arith.mulf %30, %23 : vector<8x256xf32>
    %c48 = arith.constant 48 : index
    %c0_21 = arith.constant 0 : index
    %32 = vector.load %arg9[%c48, %c0_21] : memref<72x256xf32, #tpu.memory_space<vmem>>, vector<8x256xf32>
    tpu.vector_store %arg9[%c48, %c0_21], %31 {strides = array<i32>} : memref<72x256xf32, #tpu.memory_space<vmem>>, vector<8x256xf32>,
    %c0_22 = arith.constant 0 : index
    %c112 = arith.constant 112 : index
    %33 = vector.load %arg8[%c0_22, %c112] : memref<8x512xf32, #tpu.memory_space<vmem>>, vector<8x256xf32>
    %c8 = arith.constant 8 : index
    %c0_23 = arith.constant 0 : index
    %34 = vector.load %arg9[%c8, %c0_23] : memref<72x256xf32, #tpu.memory_space<vmem>>, vector<8x256xf32>
    tpu.vector_store %arg9[%c8, %c0_23], %33 {strides = array<i32>} : memref<72x256xf32, #tpu.memory_space<vmem>>, vector<8x256xf32>,
    %c0_24 = arith.constant 0 : index
    %c128_25 = arith.constant 128 : index
    %35 = vector.load %arg8[%c0_24, %c128_25] : memref<8x512xf32, #tpu.memory_space<vmem>>, vector<8x256xf32>
    %c32 = arith.constant 32 : index
    %c0_26 = arith.constant 0 : index
    %36 = vector.load %arg9[%c32, %c0_26] : memref<72x256xf32, #tpu.memory_space<vmem>>, vector<8x256xf32>
    tpu.vector_store %arg9[%c32, %c0_26], %35 {strides = array<i32>} : memref<72x256xf32, #tpu.memory_space<vmem>>, vector<8x256xf32>,
    %c0_27 = arith.constant 0 : index
    %c144 = arith.constant 144 : index
    %37 = vector.load %arg8[%c0_27, %c144] : memref<8x512xf32, #tpu.memory_space<vmem>>, vector<8x256xf32>
    %c56 = arith.constant 56 : index
    %c0_28 = arith.constant 0 : index
    %38 = vector.load %arg9[%c56, %c0_28] : memref<72x256xf32, #tpu.memory_space<vmem>>, vector<8x256xf32>
    tpu.vector_store %arg9[%c56, %c0_28], %37 {strides = array<i32>} : memref<72x256xf32, #tpu.memory_space<vmem>>, vector<8x256xf32>,
    %39 = vector.extract_strided_slice %20 {offsets = [2, 0], sizes = [1, 256], strides = [1, 1]} : vector<3x256xf32> to vector<1x256xf32>
    %40 = vector.shape_cast %39 : vector<1x256xf32> to vector<1x256xf32>
    %41 = vector.broadcast %40 : vector<1x256xf32> to vector<8x256xf32>
    %c0_29 = arith.constant 0 : index
    %c113 = arith.constant 113 : index
    %42 = vector.load %arg8[%c0_29, %c113] : memref<8x512xf32, #tpu.memory_space<vmem>>, vector<8x256xf32>
    %43 = arith.mulf %42, %41 : vector<8x256xf32>
    %c16 = arith.constant 16 : index
    %c0_30 = arith.constant 0 : index
    %44 = vector.load %arg9[%c16, %c0_30] : memref<72x256xf32, #tpu.memory_space<vmem>>, vector<8x256xf32>
    tpu.vector_store %arg9[%c16, %c0_30], %43 {strides = array<i32>} : memref<72x256xf32, #tpu.memory_space<vmem>>, vector<8x256xf32>,
    %c0_31 = arith.constant 0 : index
    %c129 = arith.constant 129 : index
    %45 = vector.load %arg8[%c0_31, %c129] : memref<8x512xf32, #tpu.memory_space<vmem>>, vector<8x256xf32>
    %46 = arith.mulf %45, %41 : vector<8x256xf32>
    %c40 = arith.constant 40 : index
    %c0_32 = arith.constant 0 : index
    %47 = vector.load %arg9[%c40, %c0_32] : memref<72x256xf32, #tpu.memory_space<vmem>>, vector<8x256xf32>
    tpu.vector_store %arg9[%c40, %c0_32], %46 {strides = array<i32>} : memref<72x256xf32, #tpu.memory_space<vmem>>, vector<8x256xf32>,
    %c0_33 = arith.constant 0 : index
    %c145 = arith.constant 145 : index
    %48 = vector.load %arg8[%c0_33, %c145] : memref<8x512xf32, #tpu.memory_space<vmem>>, vector<8x256xf32>
    %49 = arith.mulf %48, %41 : vector<8x256xf32>
    %c64 = arith.constant 64 : index
    %c0_34 = arith.constant 0 : index
    %50 = vector.load %arg9[%c64, %c0_34] : memref<72x256xf32, #tpu.memory_space<vmem>>, vector<8x256xf32>
    tpu.vector_store %arg9[%c64, %c0_34], %49 {strides = array<i32>} : memref<72x256xf32, #tpu.memory_space<vmem>>, vector<8x256xf32>,
    %c0_35 = arith.constant 0 : index
    %c0_36 = arith.constant 0 : index
    %51 = vector.load %arg3[%c0_35, %c0_36] : memref<8x72xf32, #tpu.memory_space<vmem>>, vector<8x72xf32>
    %c0_37 = arith.constant 0 : index
    %c0_38 = arith.constant 0 : index
    %52 = vector.load %arg9[%c0_37, %c0_38] : memref<72x256xf32, #tpu.memory_space<vmem>>, vector<72x256xf32>
    %cst_39 = arith.constant dense<0.000000e+00> : vector<8x256xf32>
    %53 = tpu.matmul %51, %52, %cst_39 {dimension_numbers = #tpu.dot_dimension_numbers<[1], [0], [0], [1], [0, 0, 1, 1], [], []>} : vector<8x72xf32>, vector<72x256xf32>, vector<8x256xf32> -> vector<8x256xf32>
    %54 = vector.broadcast %4 : vector<8x1xf32> to vector<8x256xf32>
    %55 = arith.mulf %53, %54 : vector<8x256xf32>
    %56 = vector.broadcast %5 : vector<8x1xf32> to vector<8x256xf32>
    %57 = arith.addf %55, %56 : vector<8x256xf32>
    %cst_40 = arith.constant 0.000000e+00 : f32
    %58 = vector.broadcast %cst_40 : f32 to vector<8x256xf32>
    %59 = arith.maximumf %57, %58 : vector<8x256xf32>
    %cst_41 = arith.constant 0.000000e+00 : f32
    %60 = vector.broadcast %cst_41 : f32 to vector<8x256xf32>
    %61 = arith.subf %60, %53 : vector<8x256xf32>
    %62 = vector.broadcast %6 : vector<8x1xf32> to vector<8x256xf32>
    %63 = arith.mulf %61, %62 : vector<8x256xf32>
    %64 = vector.broadcast %7 : vector<8x1xf32> to vector<8x256xf32>
    %65 = arith.addf %63, %64 : vector<8x256xf32>
    %cst_42 = arith.constant 0.000000e+00 : f32
    %66 = vector.broadcast %cst_42 : f32 to vector<8x256xf32>
    %67 = arith.maximumf %65, %66 : vector<8x256xf32>
    %68 = tpu.concatenate %59, %67 in 0 : vector<8x256xf32>, vector<8x256xf32> -> vector<16x256xf32>
    %c0_43 = arith.constant 0 : index
    %c0_44 = arith.constant 0 : index
    %69 = vector.load %arg4[%c0_43, %c0_44] : memref<16x16xf32, #tpu.memory_space<vmem>>, vector<16x16xf32>
    %cst_45 = arith.constant dense<0.000000e+00> : vector<16x256xf32>
    %70 = tpu.matmul %69, %68, %cst_45 {dimension_numbers = #tpu.dot_dimension_numbers<[1], [0], [0], [1], [0, 0, 1, 1], [], []>} : vector<16x16xf32>, vector<16x256xf32>, vector<16x256xf32> -> vector<16x256xf32>
    %71 = vector.broadcast %8 : vector<16x1xf32> to vector<16x256xf32>
    %72 = arith.addf %70, %71 : vector<16x256xf32>
    %cst_46 = arith.constant 0.000000e+00 : f32
    %73 = vector.broadcast %cst_46 : f32 to vector<16x256xf32>
    %74 = arith.maximumf %72, %73 : vector<16x256xf32>
    %75 = arith.addf %74, %1 : vector<16x256xf32>
    %c0_47 = arith.constant 0 : index
    %c0_48 = arith.constant 0 : index
    %c0_49 = arith.constant 0 : index
    %76 = vector.load %arg7[%c0_47, %c0_48, %c0_49] : memref<1x16x256xf32, #tpu.memory_space<vmem>>, vector<1x16x256xf32>
    %77 = vector.shape_cast %76 : vector<1x16x256xf32> to vector<16x256xf32>
    %78 = vector.shape_cast %75 : vector<16x256xf32> to vector<1x16x256xf32>
    tpu.vector_store %arg7[%c0_47, %c0_48, %c0_49], %78 {strides = array<i32>} : memref<1x16x256xf32, #tpu.memory_space<vmem>>, vector<1x16x256xf32>,
    return
  }
  func.func @transform_0(%arg0: i32) -> (i32, i32, i32) {
    %c0_i32 = arith.constant 0 : i32
    %c0_i32_0 = arith.constant 0 : i32
    %c0_i32_1 = arith.constant 0 : i32
    return %arg0, %c0_i32, %c0_i32_0 : i32, i32, i32
  }
  func.func @transform_1(%arg0: i32) -> (i32, i32) {
    %c0_i32 = arith.constant 0 : i32
    %c0_i32_0 = arith.constant 0 : i32
    %c0_i32_1 = arith.constant 0 : i32
    return %c0_i32, %c0_i32_0 : i32, i32
  }
  func.func @transform_2(%arg0: i32) -> (i32, i32) {
    %c0_i32 = arith.constant 0 : i32
    %c0_i32_0 = arith.constant 0 : i32
    %c0_i32_1 = arith.constant 0 : i32
    return %c0_i32, %c0_i32_0 : i32, i32
  }
  func.func @transform_3(%arg0: i32) -> (i32, i32) {
    %c0_i32 = arith.constant 0 : i32
    %c0_i32_0 = arith.constant 0 : i32
    %c0_i32_1 = arith.constant 0 : i32
    return %c0_i32, %c0_i32_0 : i32, i32
  }
  func.func @transform_4(%arg0: i32) -> (i32, i32) {
    %c0_i32 = arith.constant 0 : i32
    %c0_i32_0 = arith.constant 0 : i32
    %c0_i32_1 = arith.constant 0 : i32
    return %c0_i32, %c0_i32_0 : i32, i32
  }
  func.func @transform_5(%arg0: i32) -> (i32, i32) {
    %c0_i32 = arith.constant 0 : i32
    %c0_i32_0 = arith.constant 0 : i32
    %c0_i32_1 = arith.constant 0 : i32
    return %c0_i32, %c0_i32_0 : i32, i32
  }
  func.func @transform_6(%arg0: i32) -> (i32, i32, i32) {
    %c0_i32 = arith.constant 0 : i32
    %c0_i32_0 = arith.constant 0 : i32
    %c0_i32_1 = arith.constant 0 : i32
    return %arg0, %c0_i32, %c0_i32_0 : i32, i32, i32
  }
}

</mosaic_0001>

<bundles_post_ra>
// kernel: _lambda_.1
= control target key start
LH: loop header
LB: loop body
LE: loop exit
PB: predicated region body
PF: predicated region fallthrough
CT: control target
= control target key end

     0   :  { %s993_s21 = smov 0   ;;  %s1156_s0 = inlined_call_operand.vmem [shape: f32[2,16,256], index: 0, kind: input, shape index: {}]   ;;  %s1157_s1 = inlined_call_operand.vmem [shape: f32[8,16], index: 1, kind: input, shape index: {}]   ;;  %s1158_s2 = inlined_call_operand.vmem [shape: f32[8,72], index: 2, kind: input, shape index: {}]   ;;  %s1159_s3 = inlined_call_operand.vmem [shape: f32[16,16], index: 3, kind: input, shape index: {}]   ;;  %s1160_s4 = inlined_call_operand.vmem [shape: f32[56,1], index: 4, kind: input, shape index: {}]   ;;  %s1161_s5 = inlined_call_operand.vmem [shape: f32[3,256], index: 5, kind: input, shape index: {}]   ;;  %s1162_s6 = inlined_call_operand.vmem [shape: f32[2,16,256], index: 6, kind: output, shape index: {}]  }
   0x1 LB: > { %s903_s22 = sadd.s32 4294967295, %s946_s21   ;;  %p907_p0 = scmp.ge.s32.totalorder %s946_s21, 1  ;;  %s946_s21 = sphi %s993_s21, %s16_s21  }
   0x2   : > { %p212_p1 = scmp.lt.s32.totalorder %s946_s21, 3 }
   0x4   : > { %p213_p2 = pnand %p907_p0, %p212_p1 }
   0x5   : > { %p242_p3 = scmp.lt.s32.totalorder (!%p213_p2), %s903_s22, 1  ;;  %s950_s9 = smov (!%p213_p2), 17  }
   0x6   : > { %216 = sbr.rel (%p213_p2) target bundleno = 779 (0x30b), region = 44  ;;  %s951_s10 = smov (!%p213_p2), 15  }
   0x7   : > { %s952_s11 = smov (!%p213_p2), 1   ;;  %s953_s12 = smov (!%p213_p2), 127  }
   0x8   : > { %s954_s13 = smov (!%p213_p2), 113   ;;  %s955_s14 = smov (!%p213_p2), 111  }
   0x9   : > { %s956_s15 = smov (!%p213_p2), 112   ;;  %s957_s16 = smov (!%p213_p2), 16  }
   0xb   : > { %v256_v0 = vld [vmem:[%s1160_s4] sm:$0xff]  ;;  %v352_v1 = vlaneseq  ;;  %v948_v2 = vmov 0.0   ;;  %v949_v3 = vmov 0   ;;  %s1164_s22 = smov (!%p242_p3, %s903_s22), 1  ;;  %vm269_vm0 = vcmask 130048  }
   0xc   : > { %337 = vmatprep.mubr.f32.mxu0 %v948_v2  ;;  %938 = vset.pattern.permute.xlu0 %v949_v3  ;;  %v350_v5 = vld [vmem:[%s1161_s5] sm:$0x77]  ;;  %s918_s27 = sshll.u32 %s1164_s22, 5  ;;  %vm410_vm1 = vcmask 1039360   ;;  %vm458_vm2 = vcmask 924672   ;;  %vm396_vm3 = vcmask 138240  }
   0xd   : > { %266 = vperm.xlu0 %938, %v256_v0   ;;  %v353_v4 = vshrl.u32 %v352_v1, 7  ;;  %700 = vmatprep.mubr.f32.mxu1 %v948_v2  ;;  %s246_s30 = scalar_lea.vmem %s1156_s0, %s918_s27  ;;  %v263_v18 = vld [vmem:[%s1157_s1] sm:$0xff]  ;;  %vm441_vm4 = vcmask 121856   ;;  %vm427_vm5 = vcmask 7168   ;;  %vm379_vm6 = vcmask 908288  }
   0xe   : > { %939 = vset.pattern.permute.xlu1 %v949_v3  ;;  %v1017_v10 = vld [vmem:[%s246_s30 + $0x18] sm:$0xff]  ;;  %v1019_v11 = vld [vmem:[%s246_s30 + $0x10] sm:$0xff]  ;;  %v1021_v12 = vld [vmem:[%s246_s30 + $0x8] sm:$0xff]  ;;  %vm499_vm7 = vcmask 916480   ;;  %vm632_vm8 = vcmask 588800  }
   0xf   : > { %v508_v6 = vsub.s32 2, %v353_v4  ;;  %v512_v7 = vsub.s32 6, %v353_v4  ;;  %v354_v8 = vsub.s32 0, %v353_v4  ;;  %v358_v9 = vsub.s32 4, %v353_v4  ;;  %301 = vmatprep.subr.mxu0 %v1017_v10  ;;  %v1024_v16 = vld [vmem:[%s246_s30] sm:$0xff]  ;;  %v257_v3 = vld [vmem:[%s1160_s4 + $0x8] sm:$0xff] }
  0x10   : > { %302 = vmatpush1.msra.mxu0 %v1019_v11  ;;  %v258_v4 = vld [vmem:[%s1160_s4 + $0x10] sm:$0xff] }
  0x11   : > { %v513_v13 = vrot.slane %v350_v5, %v512_v7  ;;  %v509_v14 = vrot.slane %v350_v5, %v508_v6  ;;  %v355_v15 = vrot.slane %v350_v5, %v354_v8  ;;  %v359_v17 = vrot.slane %v350_v5, %v358_v9  ;;  %303 = vmatprep.subr.mxu0 %v1021_v12  ;;  %v259_v5 = vld [vmem:[%s1160_s4 + $0x18] sm:$0xff]  ;;  %v260_v7 = vld [vmem:[%s1160_s4 + $0x20] sm:$0xff] }
  0x12   : > { %304 = vmatpush1.msra.mxu0 %v1024_v16 }
  0x13   : > { %v523_v19 = vrot.slane %v513_v13, %v508_v6  ;;  %v519_v20 = vrot.slane %v509_v14, %v508_v6  ;;  %v365_v21 = vrot.slane %v355_v15, %v354_v8  ;;  %912 = vmatmul.mubr.msk.f32.vlgmr.msra.gmra.mxu0 %vm269_vm0, %v263_v18  ;;  %v369_v22 = vrot.slane %v359_v17, %v354_v8  ;;  %v262_v6 = vld [vmem:[%s1160_s4 + $0x30] sm:$0xff]  ;;  %v261_v8 = vld [vmem:[%s1160_s4 + $0x28] sm:$0xff] }
  0x14   : > { %823 = vmatprep.mubr.f32.mxu0 %v948_v2 }
  0x15   : > { %589 = vrot.lane.b32.xlu1 %v523_v19, %s950_s9  ;;  %587 = vrot.lane.b32.xlu0 %v519_v20, %s950_s9 }
  0x19   : > { %437 = vrot.lane.b32.xlu1 %v365_v21, %s951_s10  ;;  %439 = vrot.lane.b32.xlu0 %v369_v22, %s951_s10 }
  0x1d   : > { %558 = vrot.lane.b32.xlu1 %v519_v20, %s952_s11  ;;  %560 = vrot.lane.b32.xlu0 %v523_v19, %s952_s11 }
  0x21   : > { %406 = vrot.lane.b32.xlu1 %v365_v21, %s953_s12  ;;  %408 = vrot.lane.b32.xlu0 %v369_v22, %s953_s12 }
  0x25   : > { %529 = vrot.lane.b32.xlu1 %v519_v20, %s954_s13  ;;  %531 = vrot.lane.b32.xlu0 %v523_v19, %s954_s13 }
  0x29   : > { %375 = vrot.lane.b32.xlu1 %v365_v21, %s955_s14  ;;  %377 = vrot.lane.b32.xlu0 %v369_v22, %s955_s14 }
  0x2d   : > { %497 = vrot.lane.b32.xlu1 %v948_v2, %s956_s15 }
  0x87   : > { %v590_v23 = vpop.permute.xlu1 %589 }
  0x88   : > { %v267_v24 = vpop.permute.xlu0 %266  ;;  %v597_v25 = vmul.f32 0.0, %v590_v23 }
  0x8a   : > { %605 = vrot.lane.b32.xlu0 %v597_v25, %s955_s14 }
  0x8b   : > { %v438_v26 = vpop.permute.xlu1 %437 }
  0x8c   : > { %v588_v27 = vpop.permute.xlu0 %587 }
  0x8d   : > { %v591_v52 = vsel %vm396_vm3, %v588_v27, %v590_v23 }
  0x8f   : > { %v559_v28 = vpop.permute.xlu1 %558 }
  0x90   : > { %v440_v29 = vpop.permute.xlu0 %439 }
  0x91   : > { %v448_v30 = vmul.f32 0.0, %v440_v29  ;;  %v442_v54 = vsel %vm441_vm4, %v438_v26, %v440_v29 }
  0x93   : > { %456 = vrot.lane.b32.xlu0 %v448_v30, %s954_s13  ;;  %v407_v31 = vpop.permute.xlu1 %406 }
  0x94   : > { %v561_v32 = vpop.permute.xlu0 %560  ;;  %v415_v34 = vmul.f32 0.0, %v407_v31 }
  0x95   : > { %v568_v33 = vmul.f32 0.0, %v561_v32  ;;  %v562_v55 = vsel %vm427_vm5, %v559_v28, %v561_v32 }
  0x97   : > { %576 = vrot.lane.b32.xlu1 %v568_v33, %s953_s12  ;;  %v530_v35 = vpop.permute.xlu1 %529 }
  0x98   : > { %v537_v36 = vmul.f32 0.0, %v530_v35  ;;  %v409_v42 = vpop.permute.xlu0 %408 }
  0x99   : > { %v411_v48 = vsel %vm410_vm1, %v407_v31, %v409_v42 }
  0x9a   : > { %543 = vrot.lane.b32.xlu0 %v537_v36, %s951_s10 }
  0x9b   : > { %421 = vrot.lane.b32.xlu1 %v415_v34, %s952_s11  ;;  %v376_v58 = vpop.permute.xlu1 %375 }
  0x9c   : > { %v532_v45 = vpop.permute.xlu0 %531  ;;  %v384_v0 = vmul.f32 0.0, %v376_v58 }
  0x9d   : > { %v533_v49 = vsel %vm458_vm2, %v530_v35, %v532_v45 }
  0x9f   : > { %v498_v9 = vpop.permute.xlu1 %497 }
  0xa0   : > { %v378_v59 = vpop.permute.xlu0 %377 }
  0xa1   : > { %v380_v61 = vsel %vm379_vm6, %v376_v58, %v378_v59 }
  0xd3   : > { %v339_v37 = vpop.f32.mrf.mxu0 }
  0xd4   : > { %v340_v38 = vadd.f32 %v339_v37, %v267_v24 }
  0xd5   : > { %v341_v39 = vpop.f32.mrf.mxu0 }
  0xd6   : > { %v1053_v40 = vmax.f32 %v340_v38, 0.0  ;;  %v342_v41 = vadd.f32 %v341_v39, %v267_v24 }
  0xd8   : > { %473 = vrot.lane.b32.xlu1 %v1053_v40, %s957_s16  ;;  %493 = vrot.lane.b32.xlu0 %v1053_v40, %s956_s15  ;;  %v1059_v43 = vmax.f32 %v342_v41, 0.0  ;;  %v595_v44 = vmul.f32 %v588_v27, %v1053_v40  ;;  %v566_v46 = vmul.f32 %v559_v28, %v1053_v40  ;;  %v446_v47 = vmul.f32 %v438_v26, %v1053_v40 }
  0xd9   : > { %v538_v50 = vmul.f32 %v533_v49, %v1053_v40  ;;  %v416_v51 = vmul.f32 %v411_v48, %v1053_v40  ;;  %v385_v62 = vmul.f32 %v380_v61, %v1053_v40 }
  0xda   : > { %v596_v53 = vmul.f32 %v591_v52, %v1059_v43  ;;  %v567_v56 = vmul.f32 %v562_v55, %v1059_v43  ;;  %v447_v57 = vmul.f32 %v442_v54, %v1059_v43  ;;  %v417_v60 = vmul.f32 %v409_v42, %v1059_v43 }
  0xdb   : > { %v539_v63 = vmul.f32 %v532_v45, %v1059_v43  ;;  %v386_v1 = vmul.f32 %v378_v59, %v1059_v43 }
  0xdc   : > { %495 = vrot.lane.b32.xlu0 %v1059_v43, %s956_s15  ;;  %601 = vrot.lane.b32.xlu1 %v595_v44, %s955_s14 }
  0xe0   : > { %572 = vrot.lane.b32.xlu0 %v566_v46, %s953_s12  ;;  %452 = vrot.lane.b32.xlu1 %v446_v47, %s954_s13 }
  0xe4   : > { %545 = vrot.lane.b32.xlu0 %v538_v50, %s951_s10  ;;  %423 = vrot.lane.b32.xlu1 %v416_v51, %s952_s11 }
  0xe8   : > { %475 = vrot.lane.b32.xlu0 %v1059_v43, %s957_s16  ;;  %603 = vrot.lane.b32.xlu1 %v596_v53, %s955_s14  ;;  %v613_v53 = vld [vmem:[%s1158_s2] sm:$0xff] }
  0xec   : > { %574 = vrot.lane.b32.xlu0 %v567_v56, %s953_s12  ;;  %454 = vrot.lane.b32.xlu1 %v447_v57, %s954_s13 }
  0xf0   : > { %425 = vrot.lane.b32.xlu0 %v417_v60, %s952_s11  ;;  %471 = vrot.lane.b32.xlu1 %v948_v2, %s957_s16  ;;  %s251_s16 = scalar_lea.vmem %s1162_s6, %s918_s27 }
  0xf4   : > { %547 = vrot.lane.b32.xlu1 %v539_v63, %s951_s10  ;;  %392 = vrot.lane.b32.xlu0 %v385_v62, %s950_s9 }
  0xf8   : > { %394 = vrot.lane.b32.xlu1 %v386_v1, %s950_s9  ;;  %390 = vrot.lane.b32.xlu0 %v384_v0, %s950_s9 }
  0xfc   : > { %709 = vperm.xlu0 %938, %v257_v3   ;;  %727 = vperm.xlu1 %939, %v259_v5   ;;  %v606_v13 = vpop.permute.xlu0 %605 }
 0x100   : > { %716 = vperm.xlu0 %938, %v258_v4   ;;  %734 = vperm.xlu1 %939, %v260_v7  }
 0x104   : > { %750 = vperm.xlu0 %938, %v262_v6   ;;  %745 = vperm.xlu1 %939, %v261_v8  }
 0x105   : > { %v457_v14 = vpop.permute.xlu0 %456 }
 0x109   : > { %v577_v15 = vpop.permute.xlu1 %576 }
 0x10c   : > { %v544_v17 = vpop.permute.xlu0 %543 }
 0x10d   : > { %v422_v18 = vpop.permute.xlu1 %421 }
 0x14a   : > { %v474_v19 = vpop.permute.xlu1 %473  ;;  %v494_v20 = vpop.permute.xlu0 %493 }
 0x14e   : > { %v496_v21 = vpop.permute.xlu0 %495  ;;  %v602_v22 = vpop.permute.xlu1 %601 }
 0x14f   : > { %v501_v31 = vsel %vm499_vm7, %v496_v21, %v498_v9  ;;  %v500_v34 = vsel %vm499_vm7, %v494_v20, %v496_v21 }
 0x152   : > { %v573_v23 = vpop.permute.xlu0 %572  ;;  %v453_v24 = vpop.permute.xlu1 %452 }
 0x156   : > { %v546_v25 = vpop.permute.xlu0 %545  ;;  %v424_v26 = vpop.permute.xlu1 %423 }
 0x157   : > { %v428_v46 = vsel %vm427_vm5, %v422_v18, %v424_v26  ;;  %v549_v48 = vsel %vm441_vm4, %v544_v17, %v546_v25 }
 0x15a   : > { %v476_v27 = vpop.permute.xlu0 %475  ;;  %v604_v28 = vpop.permute.xlu1 %603 }
 0x15b   : > { %v608_v29 = vsel %vm379_vm6, %v604_v28, %v606_v13  ;;  %v607_v30 = vsel %vm379_vm6, %v602_v22, %v604_v28  ;;  %v478_v49 = vsel %vm269_vm0, %v474_v19, %v476_v27 }
 0x15c   : > { %650 = vmatprep.subr.mxu1 %v608_v29 }
 0x15d   : > { %651 = vmatpush1.msra.mxu1 %v607_v30 }
 0x15e   : > { %v575_v32 = vpop.permute.xlu0 %574  ;;  %652 = vmatprep.subr.mxu1 %v501_v31  ;;  %v455_v33 = vpop.permute.xlu1 %454 }
 0x15f   : > { %653 = vmatpush1.msra.mxu1 %v500_v34  ;;  %v460_v35 = vsel %vm458_vm2, %v455_v33, %v457_v14  ;;  %v459_v36 = vsel %vm458_vm2, %v453_v24, %v455_v33  ;;  %v579_v37 = vsel %vm410_vm1, %v575_v32, %v577_v15  ;;  %v578_v41 = vsel %vm410_vm1, %v573_v23, %v575_v32  ;;  %v741_v14 = vld [vmem:[%s1159_s3] sm:$0xff]  ;;  %v742_v15 = vld [vmem:[%s1159_s3 + $0x8] sm:$0xff] }
 0x160   : > { %654 = vmatprep.subr.mxu1 %v460_v35 }
 0x161   : > { %655 = vmatpush1.msra.mxu1 %v459_v36 }
 0x162   : > { %v426_v38 = vpop.permute.xlu0 %425  ;;  %656 = vmatprep.subr.mxu1 %v579_v37  ;;  %v472_v39 = vpop.permute.xlu1 %471 }
 0x163   : > { %657 = vmatpush1.msra.mxu1 %v578_v41  ;;  %v429_v42 = vsel %vm427_vm5, %v424_v26, %v426_v38 }
 0x164   : > { %658 = vmatprep.subr.mxu1 %v1059_v43 }
 0x165   : > { %659 = vmatpush1.msra.mxu1 %v1053_v40  ;;  %v477_v40 = vsel %vm269_vm0, %v472_v39, %v474_v19 }
 0x166   : > { %660 = vmatprep.subr.mxu1 %v429_v42  ;;  %v548_v44 = vpop.permute.xlu1 %547  ;;  %v393_v45 = vpop.permute.xlu0 %392 }
 0x167   : > { %661 = vmatpush1.msra.mxu1 %v428_v46  ;;  %v550_v47 = vsel %vm441_vm4, %v546_v25, %v548_v44 }
 0x168   : > { %662 = vmatprep.subr.mxu1 %v550_v47 }
 0x169   : > { %663 = vmatpush1.msra.mxu1 %v549_v48 }
 0x16a   : > { %664 = vmatprep.subr.mxu1 %v478_v49  ;;  %v395_v43 = vpop.permute.xlu1 %394  ;;  %v391_v50 = vpop.permute.xlu0 %390 }
 0x16b   : > { %665 = vmatpush1.msra.mxu1 %v477_v40  ;;  %v398_v51 = vsel %vm396_vm3, %v393_v45, %v395_v43  ;;  %v397_v52 = vsel %vm396_vm3, %v391_v50, %v393_v45 }
 0x16c   : > { %666 = vmatprep.subr.mxu1 %v398_v51 }
 0x16d   : > { %667 = vmatpush1.msra.mxu1 %v397_v52 }
 0x16e   : > { %913 = vmatmul.mubr.msk.f32.vlgmr.msra.gmra.mxu1 %vm632_vm8, %v613_v53 }
 0x177   : > { %v728_v54 = vpop.permute.xlu1 %727  ;;  %v710_v55 = vpop.permute.xlu0 %709 }
 0x17b   : > { %v735_v63 = vpop.permute.xlu1 %734  ;;  %v717_v1 = vpop.permute.xlu0 %716 }
 0x17f   : > { %v746_v17 = vpop.permute.xlu1 %745  ;;  %v751_v23 = vpop.permute.xlu0 %750 }
 0x22e   : > { %v702_v56 = vpop.f32.mrf.mxu1 }
 0x22f   : > { %v723_v57 = vsub.f32 0.0, %v702_v56  ;;  %v712_v62 = vmul.f32 %v710_v55, %v702_v56 }
 0x230   : > { %v704_v58 = vpop.f32.mrf.mxu1 }
 0x231   : > { %v730_v59 = vmul.f32 %v728_v54, %v723_v57  ;;  %v713_v60 = vmul.f32 %v710_v55, %v704_v58  ;;  %v724_v61 = vsub.f32 0.0, %v704_v58  ;;  %v719_v6 = vadd.f32 %v717_v1, %v712_v62 }
 0x233   : > { %v731_v0 = vmul.f32 %v728_v54, %v724_v61  ;;  %v737_v3 = vadd.f32 %v735_v63, %v730_v59  ;;  %v720_v4 = vadd.f32 %v717_v1, %v713_v60  ;;  %v721_v13 = vmax.f32 %v719_v6, 0.0 }
 0x235   : > { %v738_v5 = vadd.f32 %v735_v63, %v731_v0  ;;  %v739_v8 = vmax.f32 %v737_v3, 0.0  ;;  %v722_v9 = vmax.f32 %v720_v4, 0.0 }
 0x237   : > { %v740_v7 = vmax.f32 %v738_v5, 0.0 }
 0x239   : > { %787 = vmatprep.subr.mxu0 %v740_v7 }
 0x23a   : > { %788 = vmatpush1.msra.mxu0 %v739_v8 }
 0x23b   : > { %789 = vmatprep.subr.mxu0 %v722_v9 }
 0x23c   : > { %790 = vmatpush1.msra.mxu0 %v721_v13 }
 0x23d   : > { %914 = vmatmul.mubr.msk.f32.vlgmr.msra.gmra.mxu0 %vm269_vm0, %v741_v14 }
 0x23e   : > { %829 = vmatprep.mubr.f32.mxu0 %v948_v2 }
 0x241   : > { %915 = vmatmul.mubr.msk.f32.gmra.mxu0 %vm269_vm0, %v742_v15 }
 0x2fd   : > { %v825_v18 = vpop.f32.mrf.mxu0 }
 0x2fe   : > { %v826_v19 = vadd.f32 %v825_v18, %v746_v17 }
 0x2ff   : > { %v827_v20 = vpop.f32.mrf.mxu0 }
 0x300   : > { %v836_v21 = vmax.f32 %v826_v19, 0.0  ;;  %v828_v22 = vadd.f32 %v827_v20, %v746_v17 }
 0x301   : > { %v831_v24 = vpop.f32.mrf.mxu0 }
 0x302   : > { %v840_v2 = vadd.f32 %v836_v21, %v1024_v16  ;;  %v837_v25 = vmax.f32 %v828_v22, 0.0  ;;  %v832_v26 = vadd.f32 %v831_v24, %v751_v23 }
 0x303   : > { %v833_v27 = vpop.f32.mrf.mxu0 }
 0x304   : > { %844 = vst [vmem:[%s251_s16] sm:$0xff] %v840_v2  ;;  %v841_v28 = vadd.f32 %v837_v25, %v1021_v12  ;;  %v838_v29 = vmax.f32 %v832_v26, 0.0  ;;  %v834_v30 = vadd.f32 %v833_v27, %v751_v23 }
 0x306   : > { %845 = vst [vmem:[%s251_s16 + $0x8] sm:$0xff] %v841_v28  ;;  %v842_v31 = vadd.f32 %v838_v29, %v1019_v11  ;;  %v839_v32 = vmax.f32 %v834_v30, 0.0 }
 0x308   : > { %846 = vst [vmem:[%s251_s16 + $0x10] sm:$0xff] %v842_v31  ;;  %v843_v33 = vadd.f32 %v839_v32, %v1017_v10 }
 0x30a   : > { %847 = vst [vmem:[%s251_s16 + $0x18] sm:$0xff] %v843_v33 }
 0x30b PF: > { %s16_s21 = sadd.s32 1, %s946_s21  }
 0x30c   : > { %p13_p4 = scmp.ge.s32.totalorder %s16_s21, 4  }
 0x30e   :  { %15 = sbr.rel (!%p13_p4) target bundleno = 1 (0x1), region = 74 }

</bundles_post_ra>
